<compile_context>
chip_gen: v6e
topology: v6e:2x2x1
jax: 0.10.0
libtpu: 0.0.40
codegen_flags: <defaults>
</compile_context>

<pallas_src>
import functools

import jax
import jax.numpy as jnp
from jax.experimental import pallas as pl
from jax.experimental.pallas import tpu as pltpu


# --------------------------------------------------------------------------- #
# Kernel 1: projection + fused attention-score matvec
# --------------------------------------------------------------------------- #
def _project_kernel(h_ref, w_ref, a_ref, wh_ref, sq_ref, sk_ref):
    # h_ref: (TQ, F_in)   w_ref: (F_in, F_out)   a_ref: (F_out, 2)
    Wh = jnp.dot(h_ref[...], w_ref[...], preferred_element_type=jnp.float32)   # (TQ, F_out)
    # One MXU call for both logit terms (col 0 = a1 term, col 1 = a2 term).
    scores = jnp.dot(Wh, a_ref[...], preferred_element_type=jnp.float32)       # (TQ, 2)
    wh_ref[...] = Wh.astype(wh_ref.dtype)
    sq_ref[...] = scores[:, 0:1].astype(sq_ref.dtype)                          # (TQ, 1)
    # Emit key-side term lane-major so the attention kernel never transposes.
    sk_ref[...] = jnp.transpose(scores[:, 1:2]).astype(sk_ref.dtype)           # (1, TQ)


# --------------------------------------------------------------------------- #
# Kernel 2: masked softmax attention + aggregation (+ ELU)
# --------------------------------------------------------------------------- #
def _attend_kernel(wh_ref, sq_ref, sk_ref, adj_ref, out_ref, *, alpha, concat):
    # wh_ref: (N, F_out)  sq_ref: (TQ, 1)  sk_ref: (1, N)  adj_ref: (TQ, N)
    e = sq_ref[...] + sk_ref[...]                       # (TQ, N) pure VPU broadcast add
    e = jnp.where(e > 0, e, alpha * e)                  # LeakyReLU(alpha)

    # Masked softmax via post-exp multiply (softmax is shift-invariant per row;
    # every row has a self-loop so rowsum > 0).  Normalization is deferred.
    p = jnp.exp(e - jnp.max(e, axis=1, keepdims=True)) * adj_ref[...]

    # TODO(synk): F.dropout(attention, p, training=self.training) — inference
    # mode (training=False) is a no-op, intentionally omitted.

    acc = jnp.dot(p, wh_ref[...], preferred_element_type=jnp.float32)          # (TQ, F_out)
    denom = jnp.sum(p, axis=1, keepdims=True)                                  # (TQ, 1)
    # approx=False keeps full precision (approx EUP rcp can exceed 1e-4 rtol);
    # only TQ reciprocals instead of TQ*N divides either way.
    out = acc * pl.reciprocal(denom, approx=False)

    if concat:
        # ELU(x) = x if x > 0 else exp(x) - 1
        out = jnp.where(out > 0, out, jnp.exp(out) - 1.0)

    out_ref[...] = out.astype(out_ref.dtype)


# --------------------------------------------------------------------------- #
# Wrapper
# --------------------------------------------------------------------------- #
def _pick_row_tile(n, max_tile=512):
    if n <= max_tile:
        return n
    for t in (512, 256, 128):
        if n % t == 0:
            return t
    # TODO(synk): pad N to a multiple of 128 for ragged large-N graphs.
    return n


def gat_forward(h, W, a, adj, *, alpha, concat=True):
    N, in_features = h.shape
    out_features = W.shape[1]

    # Reshape a (2*F_out, 1) -> (F_out, 2) so both logit matvecs fuse and the
    # long axis is not stuck on a 1-wide lane dimension.
    a_mat = jnp.transpose(a.reshape(2, out_features))

    tq = _pick_row_tile(N)
    n_tiles = N // tq

    # ---- kernel 1: projection ------------------------------------------------
    proj_cost = pl.CostEstimate(
        flops=2 * N * in_features * out_features + 4 * N * out_features,
        transcendentals=0,
        bytes_accessed=4 * (N * in_features + in_features * out_features
                            + 2 * out_features + N * out_features + 2 * N),
    )
    wh, s_q, s_k = pl.pallas_call(
        _project_kernel,
        out_shape=(
            jax.ShapeDtypeStruct((N, out_features), jnp.float32),
            jax.ShapeDtypeStruct((N, 1), jnp.float32),
            jax.ShapeDtypeStruct((1, N), jnp.float32),
        ),
        grid=(n_tiles,),
        in_specs=[
            pl.BlockSpec((tq, in_features), lambda i: (i, 0)),
            pl.BlockSpec((in_features, out_features), lambda i: (0, 0)),
            pl.BlockSpec((out_features, 2), lambda i: (0, 0)),
        ],
        out_specs=(
            pl.BlockSpec((tq, out_features), lambda i: (i, 0)),
            pl.BlockSpec((tq, 1), lambda i: (i, 0)),
            pl.BlockSpec((1, tq), lambda i: (0, i)),
        ),
        compiler_params=pltpu.CompilerParams(dimension_semantics=("parallel",)),
        cost_estimate=proj_cost,
    )(h, W, a_mat)

    # ---- kernel 2: attention -------------------------------------------------
    attend_cost = pl.CostEstimate(
        flops=2 * N * N * out_features + 6 * N * N,
        transcendentals=N * N + N * out_features,
        bytes_accessed=4 * (N * N + 2 * N * out_features + 3 * N),
    )
    attend = functools.partial(_attend_kernel, alpha=alpha, concat=concat)
    out = pl.pallas_call(
        attend,
        out_shape=jax.ShapeDtypeStruct((N, out_features), jnp.float32),
        grid=(n_tiles,),
        in_specs=[
            pl.BlockSpec((N, out_features), lambda i: (0, 0)),   # Wh (all keys)
            pl.BlockSpec((tq, 1), lambda i: (i, 0)),             # query score term
            pl.BlockSpec((1, N), lambda i: (0, 0)),              # key score row
            pl.BlockSpec((tq, N), lambda i: (i, 0)),             # adjacency row tile
        ],
        out_specs=pl.BlockSpec((tq, out_features), lambda i: (i, 0)),
        compiler_params=pltpu.CompilerParams(dimension_semantics=("parallel",)),
        cost_estimate=attend_cost,
    )(wh, s_q, s_k, adj)
    return out


# --------------------------------------------------------------------------- #
# Reference + init helpers
# --------------------------------------------------------------------------- #
def xavier_uniform(key, shape, gain):
    fan_in, fan_out = shape[0], shape[1]
    bound = gain * jnp.sqrt(6.0 / (fan_in + fan_out))
    return jax.random.uniform(key, shape, jnp.float32, minval=-bound, maxval=bound)


def gat_reference(h, W, a, adj, *, alpha, concat=True):
    """Pure-JAX reference mirroring the PyTorch forward (training=False)."""
    out_features = W.shape[1]
    Wh = h @ W
    Wh1 = Wh @ a[:out_features, :]
    Wh2 = Wh @ a[out_features:, :]
    e = Wh1 + Wh2.T
    e = jnp.where(e > 0, e, alpha * e)
    att = jnp.where(adj > 0, e, jnp.float32(-9e15))
    att = jax.nn.softmax(att, axis=1)
    h_prime = att @ Wh
    return jax.nn.elu(h_prime) if concat else h_prime


if __name__ == "__main__":
    # Small, module-consistent shapes.
    N = 16              # number of graph nodes
    in_features = 32
    out_features = 16
    alpha = 0.2
    dropout = 0.6       # unused at inference (training=False)
    concat = True

    key = jax.random.PRNGKey(0)
    k_w, k_a, k_h, k_adj = jax.random.split(key, 4)

    # Deterministic parameter init, mirroring nn.init.xavier_uniform_(gain=1.414).
    W = xavier_uniform(k_w, (in_features, out_features), gain=1.414)
    a = xavier_uniform(k_a, (2 * out_features, 1), gain=1.414)

    # Example inputs: node features + random symmetric adjacency with self-loops.
    h = jax.random.normal(k_h, (N, in_features), jnp.float32)
    adj_rand = (jax.random.uniform(k_adj, (N, N)) > 0.5).astype(jnp.float32)
    adj = jnp.maximum(adj_rand, adj_rand.T)
    adj = jnp.maximum(adj, jnp.eye(N, dtype=jnp.float32))

    out = gat_forward(h, W, a, adj, alpha=alpha, concat=concat)
    out = jax.block_until_ready(out)

    ref = gat_reference(h, W, a, adj, alpha=alpha, concat=concat)
    assert out.shape == (N, out_features)
    assert jnp.allclose(out, ref, atol=1e-4, rtol=1e-4), "mismatch vs reference"

    print("KERNEL_OK")
</pallas_src>

<mosaic_0001>
module attributes {stable_mosaic.version = 11 : i64} {
  func.func @_project_kernel(%arg0: i32, %arg1: memref<16x32xf32, #tpu.memory_space<vmem>>, %arg2: memref<32x16xf32, #tpu.memory_space<vmem>>, %arg3: memref<16x2xf32, #tpu.memory_space<vmem>>, %arg4: memref<16x16xf32, #tpu.memory_space<vmem>>, %arg5: memref<16x1xf32, #tpu.memory_space<vmem>>, %arg6: memref<1x16xf32, #tpu.memory_space<vmem>>) attributes {dimension_semantics = [#tpu.dimension_semantics<parallel>], iteration_bounds = array<i64: 1>, scalar_prefetch = 0 : i64, scratch_operands = 0 : i64, tpu.core_type = #tpu.core_type<tc>, window_params = [{transform_indices = @transform_0, window_bounds = array<i64: 16, 32>}, {pipeline_mode = #tpu.pipeline_mode<synchronous>, transform_indices = @transform_1, window_bounds = array<i64: 32, 16>}, {pipeline_mode = #tpu.pipeline_mode<synchronous>, transform_indices = @transform_2, window_bounds = array<i64: 16, 2>}, {transform_indices = @transform_3, window_bounds = array<i64: 16, 16>}, {transform_indices = @transform_4, window_bounds = array<i64: 16, 1>}, {transform_indices = @transform_5, window_bounds = array<i64: 1, 16>}]} {
    %c0 = arith.constant 0 : index
    %c0_0 = arith.constant 0 : index
    %0 = vector.load %arg1[%c0, %c0_0] : memref<16x32xf32, #tpu.memory_space<vmem>>, vector<16x32xf32>
    %c0_1 = arith.constant 0 : index
    %c0_2 = arith.constant 0 : index
    %1 = vector.load %arg2[%c0_1, %c0_2] : memref<32x16xf32, #tpu.memory_space<vmem>>, vector<32x16xf32>
    %cst = arith.constant dense<0.000000e+00> : vector<16x16xf32>
    %2 = tpu.matmul %0, %1, %cst {dimension_numbers = #tpu.dot_dimension_numbers<[1], [0], [0], [1], [0, 0, 1, 1], [], []>} : vector<16x32xf32>, vector<32x16xf32>, vector<16x16xf32> -> vector<16x16xf32>
    %c0_3 = arith.constant 0 : index
    %c0_4 = arith.constant 0 : index
    %3 = vector.load %arg3[%c0_3, %c0_4] : memref<16x2xf32, #tpu.memory_space<vmem>>, vector<16x2xf32>
    %cst_5 = arith.constant dense<0.000000e+00> : vector<16x2xf32>
    %4 = tpu.matmul %2, %3, %cst_5 {dimension_numbers = #tpu.dot_dimension_numbers<[1], [0], [0], [1], [0, 0, 1, 1], [], []>} : vector<16x16xf32>, vector<16x2xf32>, vector<16x2xf32> -> vector<16x2xf32>
    %c0_6 = arith.constant 0 : index
    %c0_7 = arith.constant 0 : index
    %5 = vector.load %arg4[%c0_6, %c0_7] : memref<16x16xf32, #tpu.memory_space<vmem>>, vector<16x16xf32>
    tpu.vector_store %arg4[%c0_6, %c0_7], %2 {strides = array<i32>} : memref<16x16xf32, #tpu.memory_space<vmem>>, vector<16x16xf32>,
    %6 = vector.extract_strided_slice %4 {offsets = [0, 0], sizes = [16, 1], strides = [1, 1]} : vector<16x2xf32> to vector<16x1xf32>
    %c0_8 = arith.constant 0 : index
    %c0_9 = arith.constant 0 : index
    %7 = vector.load %arg5[%c0_8, %c0_9] : memref<16x1xf32, #tpu.memory_space<vmem>>, vector<16x1xf32>
    tpu.vector_store %arg5[%c0_8, %c0_9], %6 {strides = array<i32>} : memref<16x1xf32, #tpu.memory_space<vmem>>, vector<16x1xf32>,
    %8 = vector.extract_strided_slice %4 {offsets = [0, 1], sizes = [16, 1], strides = [1, 1]} : vector<16x2xf32> to vector<16x1xf32>
    %9 = tpu.transpose %8, [1, 0] : vector<16x1xf32> -> vector<1x16xf32>
    %c0_10 = arith.constant 0 : index
    %c0_11 = arith.constant 0 : index
    %10 = vector.load %arg6[%c0_10, %c0_11] : memref<1x16xf32, #tpu.memory_space<vmem>>, vector<1x16xf32>
    tpu.vector_store %arg6[%c0_10, %c0_11], %9 {strides = array<i32>} : memref<1x16xf32, #tpu.memory_space<vmem>>, vector<1x16xf32>,
    return
  }
  func.func @transform_0(%arg0: i32) -> (i32, i32) {
    %c0_i32 = arith.constant 0 : i32
    %c0_i32_0 = arith.constant 0 : i32
    return %arg0, %c0_i32 : i32, i32
  }
  func.func @transform_1(%arg0: i32) -> (i32, i32) {
    %c0_i32 = arith.constant 0 : i32
    %c0_i32_0 = arith.constant 0 : i32
    %c0_i32_1 = arith.constant 0 : i32
    return %c0_i32, %c0_i32_0 : i32, i32
  }
  func.func @transform_2(%arg0: i32) -> (i32, i32) {
    %c0_i32 = arith.constant 0 : i32
    %c0_i32_0 = arith.constant 0 : i32
    %c0_i32_1 = arith.constant 0 : i32
    return %c0_i32, %c0_i32_0 : i32, i32
  }
  func.func @transform_3(%arg0: i32) -> (i32, i32) {
    %c0_i32 = arith.constant 0 : i32
    %c0_i32_0 = arith.constant 0 : i32
    return %arg0, %c0_i32 : i32, i32
  }
  func.func @transform_4(%arg0: i32) -> (i32, i32) {
    %c0_i32 = arith.constant 0 : i32
    %c0_i32_0 = arith.constant 0 : i32
    return %arg0, %c0_i32 : i32, i32
  }
  func.func @transform_5(%arg0: i32) -> (i32, i32) {
    %c0_i32 = arith.constant 0 : i32
    %c0_i32_0 = arith.constant 0 : i32
    return %c0_i32, %arg0 : i32, i32
  }
}

</mosaic_0001>

<bundles_post_ra>
// kernel: tpu_custom_call.1
= control target key start
LH: loop header
LB: loop body
LE: loop exit
PB: predicated region body
PF: predicated region fallthrough
CT: control target
= control target key end

     0   :  { %11 = vsyncpa [#allocation3], 0  ;;  %vm25_vm0 = vcmask 261120   ;;  %s425_s0 = inlined_call_operand.vmem [shape: f32[16,32], index: 0, kind: input, shape index: {}]   ;;  %s426_s1 = inlined_call_operand.vmem [shape: f32[32,16], index: 1, kind: input, shape index: {}]   ;;  %s427_s2 = inlined_call_operand.vmem [shape: f32[16,2], index: 2, kind: input, shape index: {}]   ;;  %s428_s3 = inlined_call_operand.hbm [shape: f32[16,16], index: 3, kind: output, shape index: {0}]   ;;  %s429_s4 = inlined_call_operand.vmem [shape: f32[16,1], index: 4, kind: output, shape index: {1}]   ;;  %s430_s5 = inlined_call_operand.hbm [shape: f32[1,16], index: 5, kind: output, shape index: {2}]  }
   0x1   :  { %v24_v0 = vld [vmem:[%s426_s1 + $0x18] sm:$0xff]  ;;  %v23_v1 = vld [vmem:[%s426_s1 + $0x10] sm:$0xff]  ;;  %v19_v2 = vld [vmem:[%s425_s0] sm:$0xff] }
   0x2   :  { %286 = vmatprep.subr.mxu0 %v24_v0  ;;  %v22_v3 = vld [vmem:[%s426_s1 + $0x8] sm:$0xff]  ;;  %294 = vmatprep.mubr.msk.f32.mxu0 %vm25_vm0, %v19_v2 }
   0x3   :  { %287 = vmatpush3.msra.mxu0 %v24_v0 }
   0x4   :  { %12 = vsyncpa [#allocation5], 0  ;;  %288 = vmatprep.subr.mxu0 %v23_v1  ;;  %v21_v4 = vld [vmem:[%s426_s1] sm:$0xff]  ;;  %v20_v5 = vld [vmem:[%s425_s0 + $0x8] sm:$0xff]  ;;  %vm109_vm1 = vcmask 130048   ;;  %vm193_vm2 = vcmask 7168  }
   0x5   :  { %289 = vmatpush3.msra.mxu0 %v23_v1  ;;  %v108_v6 = vld [vmem:[%s427_s2 + $0x8] sm:$0xff]  ;;  %v107_v7 = vld [vmem:[%s427_s2] sm:$0xff]  ;;  %s354_s2 = smov 127   ;;  %s355_s11 = smov [#allocation2]  }
   0x6   :  { %290 = vmatprep.subr.mxu0 %v22_v3  ;;  %297 = vmatprep.subr.mxu1 %v108_v6  ;;  %s243_s12 = sshll.u32 %s355_s11, 4  ;;  %s244_s12 = int_to_ptr.vmem [resolvable:$true] %s243_s12 }
   0x7   :  { %291 = vmatpush3.msra.mxu0 %v22_v3  ;;  %298 = vmatpush3.msra.mxu1 %v108_v6  ;;  %s310_s13 = scalar_lea.vmem %s244_s12, 256  ;;  %p315_p1 = scmp.lt.s32.totalorder %s244_s12, %s244_s12 }
   0x8   :  { %292 = vmatprep.subr.mxu0 %v21_v4  ;;  %299 = vmatprep.subr.mxu1 %v107_v7  ;;  %p311_p0 = scmp.ne.s32.totalorder %s244_s12, %s310_s13  ;;  %p316_p2 = scmp.lt.s32.totalorder %s310_s13, %s310_s13 }
   0x9   :  { %293 = vmatpush3.msra.mxu0 %v21_v4  ;;  %300 = vmatpush3.msra.mxu1 %v107_v7 }
   0xa   :  { %295 = vmatmul.mubr.msk.f32.vlgmr.msra.gmra.mxu0 %vm25_vm0, %v20_v5  ;;  %p317_p3 = por %p316_p2, %p315_p1 }
   0xc   :  { %p318_p4 = pnand %p317_p3, %p311_p0 }
  0xca   :  { %v296_v8 = vpop.f32.mrf.mxu0 }
  0xcb   :  { %192 = vst.msk [vmem:[#allocation2 + $0x8] sm:$0xff] %vm109_vm1, %v296_v8 }
  0xcc   :  { %v98_v9 = vpop.f32.mrf.mxu0 }
  0xcd   :  { %191 = vst.msk [vmem:[#allocation2] sm:$0xff] %vm109_vm1, %v98_v9  ;;  %301 = vmatprep.mubr.msk.f32.mxu1 %vm109_vm1, %v98_v9 }
  0xce   :  { %302 = vmatmul.mubr.msk.f32.vlgmr.msra.gmra.mxu1 %vm109_vm1, %v296_v8 }
 0x18e   :  { %v303_v10 = vpop.f32.mrf.mxu1 }
 0x18f   :  { %195 = vst.msk [vmem:[%s429_s4 + $0x8] sm:$0xff] %vm193_vm2, %v303_v10 }
 0x190   :  { %v182_v11 = vpop.f32.mrf.mxu1 }
 0x191   :  { %194 = vst.msk [vmem:[%s429_s4] sm:$0xff] %vm193_vm2, %v182_v11  ;;  %198 = vrot.lane.b32.xlu0 %v182_v11, %s354_s2 }
 0x195   :  { %200 = vrot.lane.b32.xlu0 %v303_v10, %s354_s2 }
 0x203   :  { %v199_v12 = vpop.permute.xlu0 %198 }
 0x204   :  { %321 = shalt.err (!%p318_p4)
}
 0x205   :  { %s356_s14 = smov 128   ;;  %s357_s15 = smov 8   ;;  %204 = vxpose.xlu1.b32.start [1/2] (short) (narrow) %v199_v12, 8  ;;  %vm236_vm3 = vcmask 122880  }
 0x206   :  { %249 = dma.vmem_to_hbm [thread:$0]  %s244_s12, 256, %s428_s3, [#allocation3], %s356_s14, %s356_s14, %s357_s15  }
 0x207   :  { %v201_v13 = vpop.permute.xlu0 %200  ;;  %s358_s4 = smov [#allocation4]  }
 0x208   :  { %s258_s18 = sshll.u32 %s358_s4, 4  ;;  %s259_s18 = int_to_ptr.vmem [resolvable:$true] %s258_s18 }
 0x209   :  { %205 = vxpose.xlu1.b32.end [2/2] (short) (narrow) %v201_v13, 8  ;;  %s330_s19 = scalar_lea.vmem %s259_s18, 16  ;;  %s334_s20 = scalar_lea.vmem %s259_s18, 32 }
 0x20a   :  { %p331_p5 = scmp.ne.s32.totalorder %s259_s18, %s330_s19  ;;  %p335_p6 = scmp.lt.s32.totalorder %s259_s18, %s259_s18 }
 0x20b   :  { %p336_p7 = scmp.lt.s32.totalorder %s334_s20, %s330_s19 }
 0x20d   :  { %p337_p8 = por %p336_p7, %p335_p6 }
 0x20f   :  { %p338_p9 = pnand %p337_p8, %p331_p5 }
 0x281   :  { %v220_v14 = vpop.trf.xlu1 }
 0x282   :  { %237 = vst.msk [vmem:[#allocation4] sm:$0x1] %vm236_vm3, %v220_v14 }
 0x283   :  { %341 = shalt.err (!%p338_p9)
}
 0x284   :  { %261 = dma.vmem_to_hbm [thread:$0]  %s259_s18, 16, %s430_s5, [#allocation5]  }
 0x285   :  { %350 = dma.done.wait [#allocation3], 256  }
 0x286   :  { %351 = vsyncadd [#allocation3], 4294967040 }
 0x287   :  { %352 = dma.done.wait [#allocation5], 16  }
 0x288   :  { %353 = vsyncadd [#allocation5], 4294967280 }
 0x289   :  { %270 = vsyncpa [#allocation3], 1 }
 0x28a   :  { %271 = vsyncpa [#allocation5], 1 }

</bundles_post_ra>
